<compile_context>
chip_gen: v6e
topology: v6e:2x2x1
jax: 0.10.0
libtpu: 0.0.40
codegen_flags: <defaults>
</compile_context>

<pallas_src>
import functools
import math

import jax
import jax.numpy as jnp
from jax.experimental import pallas as pl
from jax.experimental.pallas import tpu as pltpu


# ---------------------------------------------------------------------------
# helpers
# ---------------------------------------------------------------------------
def _round_up(n, m):
    return ((n + m - 1) // m) * m


def _choose_block_b(B, F_pad, itemsize, block_b=None):
    """Pick a batch tile: ~1 MiB of x per block, sublane-aligned, <= 2048 rows."""
    row_align = 8 if itemsize >= 4 else (16 if itemsize == 2 else 32)
    if block_b is None:
        target_bytes = 1 << 20  # ~1 MiB x-tile: pipeline-friendly, VMEM-safe on v7x
        bb = (target_bytes // (F_pad * itemsize)) // row_align * row_align
        block_b = int(max(row_align, min(bb, 2048)))
    block_b = int(max(row_align, _round_up(int(block_b), row_align)))
    block_b = int(min(block_b, _round_up(B, row_align)))
    return block_b


def _vmem_limit_bytes(*tile_bytes):
    """Cover double-buffered tiles + headroom; stay under v7x's 64 MiB physical."""
    total = sum(tile_bytes)
    return int(min(max(2 * total + (8 << 20), 16 << 20), 48 << 20))


def _shift_scale(mean_f32, var_f32, eps, normalize_function):
    """Hoisted normalization constants: one sqrt+divide per feature."""
    inv_std = 1.0 / (jnp.sqrt(var_f32) + eps)
    if normalize_function == "affine":
        return mean_f32, inv_std
    if normalize_function == "scale":
        return jnp.zeros_like(mean_f32), inv_std
    if normalize_function == "translate":
        return mean_f32, jnp.ones_like(var_f32)
    if normalize_function == "identity":
        return jnp.zeros_like(mean_f32), jnp.ones_like(var_f32)
    raise ValueError(f"Invalid normalization function type: {normalize_function}")


# ---------------------------------------------------------------------------
# Elementwise normalize kernel (shared by eval path and training pass 2).
# ---------------------------------------------------------------------------
def _normalize_kernel(shift_ref, scale_ref, x_ref, o_ref):
    x = x_ref[...].astype(jnp.float32)
    o_ref[...] = ((x - shift_ref[...]) * scale_ref[...]).astype(o_ref.dtype)


def _normalize_padded(x2p, shift2, scale2, block_b):
    """Normalize an already padded (B_pad, F_pad) array; returns padded output."""
    B_pad, F_pad = x2p.shape
    itemsize = jnp.dtype(x2p.dtype).itemsize
    vmem_limit = _vmem_limit_bytes(2 * block_b * F_pad * itemsize)  # in + out tile
    return pl.pallas_call(
        _normalize_kernel,
        out_shape=jax.ShapeDtypeStruct((B_pad, F_pad), x2p.dtype),
        grid=(B_pad // block_b,),
        in_specs=[
            pl.BlockSpec((1, F_pad), lambda i: (0, 0)),          # shift (broadcast)
            pl.BlockSpec((1, F_pad), lambda i: (0, 0)),          # scale (broadcast)
            pl.BlockSpec((block_b, F_pad), lambda i: (i, 0)),    # data tile
        ],
        out_specs=pl.BlockSpec((block_b, F_pad), lambda i: (i, 0)),
        compiler_params=pltpu.CompilerParams(
            dimension_semantics=("parallel",),                   # v7x: shard across TCs
            vmem_limit_bytes=vmem_limit),
    )(shift2, scale2, x2p)


# ---------------------------------------------------------------------------
# Eval-mode forward: Normalizer.normalize (no statistics update).
# ---------------------------------------------------------------------------
def pallas_normalize(x, mean, var, *, eps=1e-8, normalize_function="affine",
                     block_b=None):
    if normalize_function == "identity":
        return x
    B = x.shape[0]
    F = int(math.prod(x.shape[1:]))
    F = max(F, 1)
    x2 = x.reshape(B, F)

    F_pad = _round_up(F, 128)
    itemsize = jnp.dtype(x.dtype).itemsize
    block_b = _choose_block_b(B, F_pad, itemsize, block_b)
    B_pad = _round_up(B, block_b)
    pad_b, pad_f = B_pad - B, F_pad - F

    mean_f = mean.reshape(F).astype(jnp.float32)
    var_f = var.reshape(F).astype(jnp.float32)
    shift, scale = _shift_scale(mean_f, var_f, eps, normalize_function)

    x2p = jnp.pad(x2, ((0, pad_b), (0, pad_f)))
    shift2 = jnp.pad(shift, (0, pad_f)).reshape(1, F_pad)
    scale2 = jnp.pad(scale, (0, pad_f)).reshape(1, F_pad)

    out = _normalize_padded(x2p, shift2, scale2, block_b)
    if pad_b or pad_f:
        out = out[:B, :F]
    return out.reshape(x.shape)


# ---------------------------------------------------------------------------
# Training-mode pass 1: tiled RunningMeanStd.update (sum / sumsq reduction).
# ---------------------------------------------------------------------------
def _rms_update_kernel(count_ref, x_ref, mean_ref, var_ref,
                       new_mean_ref, new_var_ref, shift_ref, scale_ref,
                       sum_acc, sq_acc, *, batch_count, eps, normalize_function):
    i = pl.program_id(0)

    @pl.when(i == 0)
    def _init():
        sum_acc[...] = jnp.zeros_like(sum_acc)
        sq_acc[...] = jnp.zeros_like(sq_acc)

    # Per-tile partial sums.  Zero-padded rows contribute nothing, so the sums
    # are exact for the true batch even when the last tile is padded.
    x = x_ref[...].astype(jnp.float32)
    sum_acc[...] += jnp.sum(x, axis=0, keepdims=True)
    sq_acc[...] += jnp.sum(x * x, axis=0, keepdims=True)

    @pl.when(i == pl.num_programs(0) - 1)
    def _finalize():
        bf = jnp.float32(batch_count)
        count = count_ref[0].astype(jnp.float32)

        batch_mean = sum_acc[...] / bf
        if batch_count > 1:
            # torch .var(dim=0) is unbiased (ddof=1); single-pass sum/sumsq form,
            # clamped against tiny negative values from cancellation.
            batch_var = (sq_acc[...] - bf * batch_mean * batch_mean) / jnp.float32(
                batch_count - 1)
            batch_var = jnp.maximum(batch_var, 0.0)
        else:
            # PyTorch would yield NaN for a single-row batch; guard with 0.
            batch_var = jnp.zeros_like(batch_mean)

        mean = mean_ref[...]
        var = var_ref[...]

        # RunningMeanStd.update (Welford-style merge).
        delta = batch_mean - mean
        total = count + bf
        new_mean = mean + delta * (bf / total)
        m2 = var * count + batch_var * bf + delta * delta * (count * bf / total)
        new_var = m2 / total

        new_mean_ref[...] = new_mean
        new_var_ref[...] = new_var

        # Hoisted normalization constants (one sqrt+divide per feature).
        inv_std = 1.0 / (jnp.sqrt(new_var) + eps)
        if normalize_function == "affine":
            shift, scale = new_mean, inv_std
        elif normalize_function == "scale":
            shift, scale = jnp.zeros_like(new_mean), inv_std
        elif normalize_function == "translate":
            shift, scale = new_mean, jnp.ones_like(new_var)
        else:  # identity
            shift, scale = jnp.zeros_like(new_mean), jnp.ones_like(new_var)
        shift_ref[...] = shift
        scale_ref[...] = scale


def pallas_rms_forward(x, mean, var, count, *, eps=1e-8,
                       normalize_function="affine", block_b=None):
    """Training-mode Normalizer.forward for RunningMeanStd.

    Returns (normalized, new_mean, new_var, new_count)."""
    B = x.shape[0]
    F = int(math.prod(x.shape[1:]))
    F = max(F, 1)
    x2 = x.reshape(B, F)

    F_pad = _round_up(F, 128)
    itemsize = jnp.dtype(x.dtype).itemsize
    block_b = _choose_block_b(B, F_pad, itemsize, block_b)
    B_pad = _round_up(B, block_b)
    pad_b, pad_f = B_pad - B, F_pad - F

    x2p = jnp.pad(x2, ((0, pad_b), (0, pad_f)))
    mean2 = jnp.pad(mean.reshape(F).astype(jnp.float32),
                    (0, pad_f)).reshape(1, F_pad)
    var2 = jnp.pad(var.reshape(F).astype(jnp.float32),
                   (0, pad_f), constant_values=1.0).reshape(1, F_pad)
    count_i32 = count.reshape(1).astype(jnp.int32)

    kernel = functools.partial(_rms_update_kernel, batch_count=B, eps=eps,
                               normalize_function=normalize_function)
    num_tiles = B_pad // block_b
    vmem_limit = _vmem_limit_bytes(block_b * F_pad * itemsize,  # x tile (x2 dbl-buf)
                                   10 * F_pad * 4)              # (1,F) vectors/scratch

    new_mean_p, new_var_p, shift2, scale2 = pl.pallas_call(
        kernel,
        out_shape=(
            jax.ShapeDtypeStruct((1, F_pad), jnp.float32),  # new_mean
            jax.ShapeDtypeStruct((1, F_pad), jnp.float32),  # new_var
            jax.ShapeDtypeStruct((1, F_pad), jnp.float32),  # shift
            jax.ShapeDtypeStruct((1, F_pad), jnp.float32),  # scale
        ),
        grid_spec=pltpu.PrefetchScalarGridSpec(
            num_scalar_prefetch=1,                          # running count -> SMEM
            grid=(num_tiles,),
            in_specs=[
                pl.BlockSpec((block_b, F_pad), lambda i, c: (i, 0)),  # x tile
                pl.BlockSpec((1, F_pad), lambda i, c: (0, 0)),        # running mean
                pl.BlockSpec((1, F_pad), lambda i, c: (0, 0)),        # running var
            ],
            out_specs=(
                pl.BlockSpec((1, F_pad), lambda i, c: (0, 0)),
                pl.BlockSpec((1, F_pad), lambda i, c: (0, 0)),
                pl.BlockSpec((1, F_pad), lambda i, c: (0, 0)),
                pl.BlockSpec((1, F_pad), lambda i, c: (0, 0)),
            ),
            scratch_shapes=[pltpu.VMEM((1, F_pad), jnp.float32),   # sum accumulator
                            pltpu.VMEM((1, F_pad), jnp.float32)],  # sumsq accumulator
        ),
        compiler_params=pltpu.CompilerParams(
            dimension_semantics=("arbitrary",),             # reduction axis
            vmem_limit_bytes=vmem_limit),
    )(count_i32, x2p, mean2, var2)

    # Pass 2: elementwise normalization with the hoisted (shift, scale) vectors.
    if normalize_function == "identity":
        out = x
    else:
        outp = _normalize_padded(x2p, shift2, scale2, block_b)
        if pad_b or pad_f:
            outp = outp[:B, :F]
        out = outp.reshape(x.shape)

    new_mean = new_mean_p[0, :F].reshape(mean.shape)
    new_var = new_var_p[0, :F].reshape(var.shape)
    new_count = count_i32 + jnp.int32(B)   # self.count += batch_count (glue)
    return out, new_mean, new_var, new_count


if __name__ == "__main__":
    key = jax.random.PRNGKey(0)
    # Deliberately un-aligned small shapes: exercises batch padding (30 -> 32),
    # feature padding (100 -> 128) and the multi-step reduction grid (block_b=8).
    B, F = 30, 100
    x = jax.random.normal(key, (B, F), dtype=jnp.float32) * 2.0 + 0.5

    # Buffers exactly as Normalizer.__init__: zeros mean, ones var, zero count.
    mean = jnp.zeros((F,), jnp.float32)
    var = jnp.ones((F,), jnp.float32)
    count = jnp.zeros((1,), jnp.int32)

    # --- training-mode forward (RunningMeanStd, 'affine') ---
    out, new_mean, new_var, new_count = pallas_rms_forward(
        x, mean, var, count, block_b=8)
    jax.block_until_ready((out, new_mean, new_var, new_count))

    # --- eval-mode forward (normalize only) using the updated statistics ---
    out_eval = pallas_normalize(x, new_mean, new_var, block_b=8)
    jax.block_until_ready(out_eval)

    # Pure-JAX reference for the training-mode forward.
    bm = jnp.mean(x, axis=0)
    bv = jnp.var(x, axis=0, ddof=1)
    c = jnp.float32(count[0])
    tot = c + B
    ref_mean = mean + (bm - mean) * (B / tot)
    ref_var = (var * c + bv * B + (bm - mean) ** 2 * (c * B / tot)) / tot
    ref_out = (x - ref_mean) / (jnp.sqrt(ref_var) + 1e-8)

    assert jnp.allclose(new_mean, ref_mean, rtol=1e-4, atol=1e-5)
    assert jnp.allclose(new_var, ref_var, rtol=1e-4, atol=1e-5)
    assert jnp.allclose(out, ref_out, rtol=1e-4, atol=1e-4)
    assert jnp.allclose(out_eval, ref_out, rtol=1e-4, atol=1e-4)
    assert int(new_count[0]) == B

    print("KERNEL_OK")
</pallas_src>

<mosaic_0001>
module attributes {stable_mosaic.version = 11 : i64} {
  func.func @_rms_update_kernel(%arg0: i32, %arg1: memref<1xi32, #tpu.memory_space<smem>>, %arg2: memref<8x128xf32, #tpu.memory_space<vmem>>, %arg3: memref<1x128xf32, #tpu.memory_space<vmem>>, %arg4: memref<1x128xf32, #tpu.memory_space<vmem>>, %arg5: memref<1x128xf32, #tpu.memory_space<vmem>>, %arg6: memref<1x128xf32, #tpu.memory_space<vmem>>, %arg7: memref<1x128xf32, #tpu.memory_space<vmem>>, %arg8: memref<1x128xf32, #tpu.memory_space<vmem>>, %arg9: memref<1x128xf32, #tpu.memory_space<vmem>>, %arg10: memref<1x128xf32, #tpu.memory_space<vmem>>) attributes {dimension_semantics = [#tpu.dimension_semantics<arbitrary>], iteration_bounds = array<i64: 4>, scalar_prefetch = 1 : i64, scratch_operands = 2 : i64, tpu.core_type = #tpu.core_type<tc>, window_params = [{transform_indices = @transform_0, window_bounds = array<i64: 8, 128>}, {pipeline_mode = #tpu.pipeline_mode<synchronous>, transform_indices = @transform_1, window_bounds = array<i64: 1, 128>}, {pipeline_mode = #tpu.pipeline_mode<synchronous>, transform_indices = @transform_2, window_bounds = array<i64: 1, 128>}, {pipeline_mode = #tpu.pipeline_mode<synchronous>, transform_indices = @transform_3, window_bounds = array<i64: 1, 128>}, {pipeline_mode = #tpu.pipeline_mode<synchronous>, transform_indices = @transform_4, window_bounds = array<i64: 1, 128>}, {pipeline_mode = #tpu.pipeline_mode<synchronous>, transform_indices = @transform_5, window_bounds = array<i64: 1, 128>}, {pipeline_mode = #tpu.pipeline_mode<synchronous>, transform_indices = @transform_6, window_bounds = array<i64: 1, 128>}]} {
    %c0_i32 = arith.constant 0 : i32
    %0 = arith.cmpi eq, %arg0, %c0_i32 : i32
    %1 = arith.extui %0 : i1 to i32
    %c0_i32_0 = arith.constant 0 : i32
    %2 = arith.cmpi ne, %1, %c0_i32_0 : i32
    scf.if %2 {
      %cst_12 = arith.constant 0.000000e+00 : f32
      %18 = vector.broadcast %cst_12 : f32 to vector<1x128xf32>
      %c0_13 = arith.constant 0 : index
      %c0_14 = arith.constant 0 : index
      %19 = vector.load %arg9[%c0_13, %c0_14] : memref<1x128xf32, #tpu.memory_space<vmem>>, vector<1x128xf32>
      tpu.vector_store %arg9[%c0_13, %c0_14], %18 {strides = array<i32>} : memref<1x128xf32, #tpu.memory_space<vmem>>, vector<1x128xf32>,
      %cst_15 = arith.constant 0.000000e+00 : f32
      %20 = vector.broadcast %cst_15 : f32 to vector<1x128xf32>
      %c0_16 = arith.constant 0 : index
      %c0_17 = arith.constant 0 : index
      %21 = vector.load %arg10[%c0_16, %c0_17] : memref<1x128xf32, #tpu.memory_space<vmem>>, vector<1x128xf32>
      tpu.vector_store %arg10[%c0_16, %c0_17], %20 {strides = array<i32>} : memref<1x128xf32, #tpu.memory_space<vmem>>, vector<1x128xf32>,
    } else {
    }
    %c0 = arith.constant 0 : index
    %c0_1 = arith.constant 0 : index
    %3 = vector.load %arg2[%c0, %c0_1] : memref<8x128xf32, #tpu.memory_space<vmem>>, vector<8x128xf32>
    %c0_2 = arith.constant 0 : index
    %c0_3 = arith.constant 0 : index
    %4 = vector.load %arg9[%c0_2, %c0_3] : memref<1x128xf32, #tpu.memory_space<vmem>>, vector<1x128xf32>
    %cst = arith.constant dense<0.000000e+00> : vector<128xf32>
    %5 = vector.multi_reduction <add>, %3, %cst [0] : vector<8x128xf32> to vector<128xf32>
    %6 = vector.shape_cast %5 : vector<128xf32> to vector<1x128xf32>
    %7 = arith.addf %4, %6 : vector<1x128xf32>
    %c0_4 = arith.constant 0 : index
    %c0_5 = arith.constant 0 : index
    %8 = vector.load %arg9[%c0_4, %c0_5] : memref<1x128xf32, #tpu.memory_space<vmem>>, vector<1x128xf32>
    tpu.vector_store %arg9[%c0_4, %c0_5], %7 {strides = array<i32>} : memref<1x128xf32, #tpu.memory_space<vmem>>, vector<1x128xf32>,
    %c0_6 = arith.constant 0 : index
    %c0_7 = arith.constant 0 : index
    %9 = vector.load %arg10[%c0_6, %c0_7] : memref<1x128xf32, #tpu.memory_space<vmem>>, vector<1x128xf32>
    %10 = arith.mulf %3, %3 : vector<8x128xf32>
    %cst_8 = arith.constant dense<0.000000e+00> : vector<128xf32>
    %11 = vector.multi_reduction <add>, %10, %cst_8 [0] : vector<8x128xf32> to vector<128xf32>
    %12 = vector.shape_cast %11 : vector<128xf32> to vector<1x128xf32>
    %13 = arith.addf %9, %12 : vector<1x128xf32>
    %c0_9 = arith.constant 0 : index
    %c0_10 = arith.constant 0 : index
    %14 = vector.load %arg10[%c0_9, %c0_10] : memref<1x128xf32, #tpu.memory_space<vmem>>, vector<1x128xf32>
    tpu.vector_store %arg10[%c0_9, %c0_10], %13 {strides = array<i32>} : memref<1x128xf32, #tpu.memory_space<vmem>>, vector<1x128xf32>,
    %c3_i32 = arith.constant 3 : i32
    %15 = arith.cmpi eq, %arg0, %c3_i32 : i32
    %16 = arith.extui %15 : i1 to i32
    %c0_i32_11 = arith.constant 0 : i32
    %17 = arith.cmpi ne, %16, %c0_i32_11 : i32
    scf.if %17 {
      %c0_12 = arith.constant 0 : index
      %18 = memref.load %arg1[%c0_12] : memref<1xi32, #tpu.memory_space<smem>>
      %19 = arith.sitofp %18 : i32 to f32
      %c0_13 = arith.constant 0 : index
      %c0_14 = arith.constant 0 : index
      %20 = vector.load %arg9[%c0_13, %c0_14] : memref<1x128xf32, #tpu.memory_space<vmem>>, vector<1x128xf32>
      %cst_15 = arith.constant 3.000000e+01 : f32
      %21 = vector.broadcast %cst_15 : f32 to vector<1x128xf32>
      %22 = arith.divf %20, %21 : vector<1x128xf32>
      %c0_16 = arith.constant 0 : index
      %c0_17 = arith.constant 0 : index
      %23 = vector.load %arg10[%c0_16, %c0_17] : memref<1x128xf32, #tpu.memory_space<vmem>>, vector<1x128xf32>
      %cst_18 = arith.constant 3.000000e+01 : f32
      %24 = vector.broadcast %cst_18 : f32 to vector<1x128xf32>
      %25 = arith.mulf %24, %22 : vector<1x128xf32>
      %26 = arith.mulf %25, %22 : vector<1x128xf32>
      %27 = arith.subf %23, %26 : vector<1x128xf32>
      %cst_19 = arith.constant 2.900000e+01 : f32
      %28 = vector.broadcast %cst_19 : f32 to vector<1x128xf32>
      %29 = arith.divf %27, %28 : vector<1x128xf32>
      %cst_20 = arith.constant 0.000000e+00 : f32
      %30 = vector.broadcast %cst_20 : f32 to vector<1x128xf32>
      %31 = arith.maximumf %29, %30 : vector<1x128xf32>
      %c0_21 = arith.constant 0 : index
      %c0_22 = arith.constant 0 : index
      %32 = vector.load %arg3[%c0_21, %c0_22] : memref<1x128xf32, #tpu.memory_space<vmem>>, vector<1x128xf32>
      %c0_23 = arith.constant 0 : index
      %c0_24 = arith.constant 0 : index
      %33 = vector.load %arg4[%c0_23, %c0_24] : memref<1x128xf32, #tpu.memory_space<vmem>>, vector<1x128xf32>
      %34 = arith.subf %22, %32 : vector<1x128xf32>
      %cst_25 = arith.constant 3.000000e+01 : f32
      %35 = arith.addf %19, %cst_25 : f32
      %cst_26 = arith.constant 3.000000e+01 : f32
      %36 = arith.divf %cst_26, %35 : f32
      %37 = vector.broadcast %36 : f32 to vector<1x128xf32>
      %38 = arith.mulf %34, %37 : vector<1x128xf32>
      %39 = arith.addf %32, %38 : vector<1x128xf32>
      %40 = vector.broadcast %19 : f32 to vector<1x128xf32>
      %41 = arith.mulf %33, %40 : vector<1x128xf32>
      %cst_27 = arith.constant 3.000000e+01 : f32
      %42 = vector.broadcast %cst_27 : f32 to vector<1x128xf32>
      %43 = arith.mulf %31, %42 : vector<1x128xf32>
      %44 = arith.addf %41, %43 : vector<1x128xf32>
      %45 = arith.mulf %34, %34 : vector<1x128xf32>
      %cst_28 = arith.constant 3.000000e+01 : f32
      %46 = arith.mulf %19, %cst_28 : f32
      %47 = arith.divf %46, %35 : f32
      %48 = vector.broadcast %47 : f32 to vector<1x128xf32>
      %49 = arith.mulf %45, %48 : vector<1x128xf32>
      %50 = arith.addf %44, %49 : vector<1x128xf32>
      %51 = vector.broadcast %35 : f32 to vector<1x128xf32>
      %52 = arith.divf %50, %51 : vector<1x128xf32>
      %c0_29 = arith.constant 0 : index
      %c0_30 = arith.constant 0 : index
      %53 = vector.load %arg5[%c0_29, %c0_30] : memref<1x128xf32, #tpu.memory_space<vmem>>, vector<1x128xf32>
      tpu.vector_store %arg5[%c0_29, %c0_30], %39 {strides = array<i32>} : memref<1x128xf32, #tpu.memory_space<vmem>>, vector<1x128xf32>,
      %c0_31 = arith.constant 0 : index
      %c0_32 = arith.constant 0 : index
      %54 = vector.load %arg6[%c0_31, %c0_32] : memref<1x128xf32, #tpu.memory_space<vmem>>, vector<1x128xf32>
      tpu.vector_store %arg6[%c0_31, %c0_32], %52 {strides = array<i32>} : memref<1x128xf32, #tpu.memory_space<vmem>>, vector<1x128xf32>,
      %55 = math.sqrt %52 : vector<1x128xf32>
      %cst_33 = arith.constant 9.99999993E-9 : f32
      %56 = vector.broadcast %cst_33 : f32 to vector<1x128xf32>
      %57 = arith.addf %55, %56 : vector<1x128xf32>
      %cst_34 = arith.constant 1.000000e+00 : f32
      %58 = vector.broadcast %cst_34 : f32 to vector<1x128xf32>
      %59 = arith.divf %58, %57 : vector<1x128xf32>
      %c0_35 = arith.constant 0 : index
      %c0_36 = arith.constant 0 : index
      %60 = vector.load %arg7[%c0_35, %c0_36] : memref<1x128xf32, #tpu.memory_space<vmem>>, vector<1x128xf32>
      tpu.vector_store %arg7[%c0_35, %c0_36], %39 {strides = array<i32>} : memref<1x128xf32, #tpu.memory_space<vmem>>, vector<1x128xf32>,
      %c0_37 = arith.constant 0 : index
      %c0_38 = arith.constant 0 : index
      %61 = vector.load %arg8[%c0_37, %c0_38] : memref<1x128xf32, #tpu.memory_space<vmem>>, vector<1x128xf32>
      tpu.vector_store %arg8[%c0_37, %c0_38], %59 {strides = array<i32>} : memref<1x128xf32, #tpu.memory_space<vmem>>, vector<1x128xf32>,
    } else {
    }
    return
  }
  func.func @transform_0(%arg0: i32, %arg1: memref<1xi32, #tpu.memory_space<smem>>) -> (i32, i32) {
    %c0_i32 = arith.constant 0 : i32
    %c0_i32_0 = arith.constant 0 : i32
    return %arg0, %c0_i32 : i32, i32
  }
  func.func @transform_1(%arg0: i32, %arg1: memref<1xi32, #tpu.memory_space<smem>>) -> (i32, i32) {
    %c0_i32 = arith.constant 0 : i32
    %c0_i32_0 = arith.constant 0 : i32
    %c0_i32_1 = arith.constant 0 : i32
    return %c0_i32, %c0_i32_0 : i32, i32
  }
  func.func @transform_2(%arg0: i32, %arg1: memref<1xi32, #tpu.memory_space<smem>>) -> (i32, i32) {
    %c0_i32 = arith.constant 0 : i32
    %c0_i32_0 = arith.constant 0 : i32
    %c0_i32_1 = arith.constant 0 : i32
    return %c0_i32, %c0_i32_0 : i32, i32
  }
  func.func @transform_3(%arg0: i32, %arg1: memref<1xi32, #tpu.memory_space<smem>>) -> (i32, i32) {
    %c0_i32 = arith.constant 0 : i32
    %c0_i32_0 = arith.constant 0 : i32
    %c0_i32_1 = arith.constant 0 : i32
    return %c0_i32, %c0_i32_0 : i32, i32
  }
  func.func @transform_4(%arg0: i32, %arg1: memref<1xi32, #tpu.memory_space<smem>>) -> (i32, i32) {
    %c0_i32 = arith.constant 0 : i32
    %c0_i32_0 = arith.constant 0 : i32
    %c0_i32_1 = arith.constant 0 : i32
    return %c0_i32, %c0_i32_0 : i32, i32
  }
  func.func @transform_5(%arg0: i32, %arg1: memref<1xi32, #tpu.memory_space<smem>>) -> (i32, i32) {
    %c0_i32 = arith.constant 0 : i32
    %c0_i32_0 = arith.constant 0 : i32
    %c0_i32_1 = arith.constant 0 : i32
    return %c0_i32, %c0_i32_0 : i32, i32
  }
  func.func @transform_6(%arg0: i32, %arg1: memref<1xi32, #tpu.memory_space<smem>>) -> (i32, i32) {
    %c0_i32 = arith.constant 0 : i32
    %c0_i32_0 = arith.constant 0 : i32
    %c0_i32_1 = arith.constant 0 : i32
    return %c0_i32, %c0_i32_0 : i32, i32
  }
}

</mosaic_0001>

<bundles_post_ra>
// kernel: tpu_custom_call.1
= control target key start
LH: loop header
LB: loop body
LE: loop exit
PB: predicated region body
PF: predicated region fallthrough
CT: control target
= control target key end

     0   :  { %s916_s0 = inlined_call_operand.<no memory space> [shape: s32[1], index: 0, kind: input, shape index: {}]   ;;  %s917_s1 = inlined_call_operand.hbm [shape: f32[32,128], index: 1, kind: input, shape index: {}]   ;;  %s918_s2 = inlined_call_operand.vmem [shape: f32[1,128], index: 2, kind: input, shape index: {}]   ;;  %s919_s3 = inlined_call_operand.vmem [shape: f32[1,128], index: 3, kind: input, shape index: {}]   ;;  %s920_s4 = inlined_call_operand.hbm [shape: f32[1,128], index: 4, kind: output, shape index: {0}]   ;;  %s921_s5 = inlined_call_operand.hbm [shape: f32[1,128], index: 5, kind: output, shape index: {1}]   ;;  %s922_s6 = inlined_call_operand.hbm [shape: f32[1,128], index: 6, kind: output, shape index: {2}]   ;;  %s923_s7 = inlined_call_operand.hbm [shape: f32[1,128], index: 7, kind: output, shape index: {3}]  }
   0x1   :  { %13 = sst [smem:[#allocation5]] %s916_s0 }
   0x2   :  { %14 = vsyncpa [#allocation7], 0 }
   0x3   :  { %16 = vsyncpa [#allocation7 + $0x1], 0 }
   0x4   :  { %17 = vsyncpa [#allocation8], 0 }
   0x5   :  { %18 = vsyncpa [#allocation11], 0 }
   0x6   :  { %19 = vsyncpa [#allocation14], 0  ;;  %s772_s26 = smov 0   ;;  %s774_s27 = smov 0  }
   0x7   :  { %s776_s28 = smov 0   ;;  %s778_s29 = smov 0  }
   0x8 LB: > { %s791_s0 = sadd.s32 4294967295, %s721_s29   ;;  %s794_s30 = sadd.s32 1, %s721_s29   ;;  %s721_s29 = sphi %s778_s29, %s933_s29   ;;  %s717_s28 = sphi %s776_s28, %s932_s28   ;;  %s713_s27 = sphi %s774_s27, %s931_s27   ;;  %s709_s26 = sphi %s772_s26, %s930_s26  }
   0x9   : > { %s29_s8 = ssub.s32 %s721_s29, %s794_s30  ;;  %s32_s9 = sadd.s32 1, %s717_s28 }
   0xa   : > { %p30_p0 = scmp.eq.s32.totalorder %s29_s8, 0  ;;  %p39_p1 = scmp.ne.s32.totalorder %s717_s28, %s713_s27 }
   0xb   : > { %p40_p2 = scmp.eq.s32.totalorder %s721_s29, 0  ;;  %p45_p3 = scmp.ne.s32.totalorder %s713_s27, %s709_s26 }
   0xc   : > { %s804_s10 = scalar_select %p30_p0, %s717_s28, %s32_s9  }
   0xd   : > { %p41_p4 = por %p40_p2, %p39_p1  ;;  %p46_p5 = scmp.eq.s32.totalorder %s791_s0, 0 }
   0xe   : > { %p499_p6 = scmp.lt.s32.totalorder %s721_s29, 4  ;;  %s201_s12 = sand.u32 1, %s717_s28  }
   0xf   : > { %p808_p7 = por %p46_p5, %p45_p3  ;;  %s459_s13 = sshll.u32 %s201_s12, 3 }
  0x10   : > { %s460_s14 = sshll.u32 %s721_s29, 7  ;;  %s205_s18 = scalar_lea.vmem [#allocation6], %s459_s13 }
  0x11   : > { %s925_s11 = scalar_select %p808_p7, 1, 0 }
  0x12   : > { %s817_s17 = scalar_lea.hbm %s917_s1, %s460_s14  ;;  %s212_s19 = sshll.u32 %s205_s18, 4  ;;  %s819_s19 = int_to_ptr.vmem [resolvable:$true] %s212_s19 }
  0x13   : > { %p821_p8 = pnand %p499_p6, %p41_p4  ;;  %s202_s21 = scalar_lea.sflag [#allocation7], %s201_s12 }
  0x14   : > { %s551_s22 = scalar_lea.hbm %s817_s17, 128  ;;  %s556_s25 = scalar_lea.hbm %s917_s1, 512 }
  0x15   : > { %p552_p11 = scmp.ne.s32.totalorder %s817_s17, %s551_s22  ;;  %p553_p12 = pneg %p821_p8 }
  0x16   : > { %p557_p1 = scmp.lt.s32.totalorder %s817_s17, %s917_s1  ;;  %p558_p2 = scmp.lt.s32.totalorder %s556_s25, %s551_s22 }
  0x17   : > { %p554_p13 = pnand %p553_p12, %p552_p11 }
  0x18   : > { %p559_p3 = por %p558_p2, %p557_p1 }
  0x19   : > { %p555_p0 = pneg %p554_p13 }
  0x1b   : > { %p560_p4 = pnand %p559_p3, %p555_p0 }
  0x1d   : > { %563 = shalt.err (!%p560_p4)
}
  0x1e   : > { %s564_s9 = scalar_lea.vmem %s819_s19, 128  ;;  %s723_s12 = smov [#allocation6]  }
  0x1f   : > { %p565_p5 = scmp.ne.s32.totalorder %s819_s19, %s564_s9  ;;  %s569_s13 = sshll.u32 %s723_s12, 4  ;;  %s570_s13 = int_to_ptr.vmem [resolvable:$false] %s569_s13 }
  0x20   : > { %s571_s14 = scalar_lea.vmem %s570_s13, 256  ;;  %p572_p13 = scmp.lt.s32.totalorder %s819_s19, %s570_s13 }
  0x21   : > { %p567_p6 = pnand %p565_p5, %p553_p12  ;;  %p573_p9 = scmp.lt.s32.totalorder %s571_s14, %s564_s9 }
  0x23   : > { %p568_p11 = pneg %p567_p6  ;;  %p574_p10 = por %p573_p9, %p572_p13 }
  0x25   : > { %p575_p7 = pnand %p574_p10, %p568_p11 }
  0x27   : > { %578 = shalt.err (!%p575_p7)
}
  0x28   : > { %498 = dma.hbm_to_vmem [thread:$0]  (!%p821_p8), %s817_s17, 128, %s819_s19, %s202_s21  }
  0x29   : > { %p927_p0 = scmp.lt.s32.totalorder %s721_s29, 5  ;;  %p928_p1 = scmp.ge.s32.totalorder %s721_s29, 1 }
  0x2b   : > { %p218_p12 = pnand %p928_p1, %p927_p0 }
  0x2c   : > { %s223_s15 = sand.u32 (!%p218_p12), 1, %s713_s27   ;;  %p929_p9 = scmp.ne.s32.totalorder (!%p218_p12), %s925_s11, 0 }
  0x2d   : > { %221 = sbr.rel (%p218_p12) target bundleno = 242 (0xf2), region = 32  ;;  %s462_s16 = sshll.u32 (!%p218_p12), %s223_s15, 3 }
  0x2e   : > { %s224_s18 = scalar_lea.sflag (!%p218_p12), [#allocation7], %s223_s15  ;;  %s227_s22 = scalar_lea.vmem (!%p218_p12), [#allocation6], %s462_s16 }
  0x32   : > { %692 = dma.done.wait (%p929_p9), %s224_s18, 128  }
  0x33   : > { %694 = vsyncadd (%p929_p9), %s224_s18, 4294967168  ;;  %p463_p7 = scmp.ne.s32.totalorder %s791_s0, 0 }
  0x35   : > { %254 = sbr.rel (%p463_p7) target bundleno = 60 (0x3c), region = 40 }
  0x3a   : > { %v724_v0 = vmov 0.0  }
  0x3b   : > { %255 = vst [vmem:[#allocation2] sm:$0x1] %v724_v0  ;;  %256 = vst [vmem:[#allocation3] sm:$0x1] %v724_v0 }
  0x3c PF: > { %v257_v1 = vld [vmem:[%s227_s22] sm:$0xff]  ;;  %p464_p8 = scmp.ne.s32.totalorder %s791_s0, 3 }
  0x3d   : > { %v259_v2 = vrot.slane %v257_v1, 4  ;;  %v268_v3 = vmul.f32 %v257_v1, %v257_v1  ;;  %s281_s29 = sld [smem:[#allocation5]] (!%p464_p8) }
  0x3f   : > { %v260_v4 = vadd.f32 %v259_v2, %v257_v1  ;;  %v269_v5 = vrot.slane %v268_v3, 4 }
  0x41   : > { %v261_v6 = vrot.slane %v260_v4, 2  ;;  %v270_v7 = vadd.f32 %v269_v5, %v268_v3 }
  0x42   : > { %v258_v12 = vld [vmem:[#allocation2] sm:$0x1]  ;;  %v267_v15 = vld [vmem:[#allocation3] sm:$0x1] }
  0x43   : > { %v262_v8 = vadd.f32 %v261_v6, %v260_v4  ;;  %v271_v9 = vrot.slane %v270_v7, 2  ;;  %s282_s11 = scvt.s32.f32 (!%p464_p8), %s281_s29 }
  0x45   : > { %v263_v10 = vrot.slane %v262_v8, 1  ;;  %v272_v11 = vadd.f32 %v271_v9, %v270_v7  ;;  %s296_s17 = sadd.f32 (!%p464_p8), 30.0, %s282_s11  ;;  %s309_s24 = smul.f32 (!%p464_p8), 30.0, %s282_s11 }
  0x47   : > { %v264_v13 = vadd.f32 %v263_v10, %v262_v8  ;;  %v273_v14 = vrot.slane %v272_v11, 1 }
  0x49   : > { %v265_v16 = vadd.f32 %v264_v13, %v258_v12  ;;  %v274_v17 = vadd.f32 %v273_v14, %v272_v11  ;;  %280 = sbr.rel (%p464_p8) target bundleno = 188 (0xbc), region = 44 }
  0x4b   : > { %266 = vst [vmem:[#allocation2] sm:$0x1] %v265_v16  ;;  %v275_v18 = vadd.f32 %v274_v17, %v267_v15 }
  0x4d   : > { %276 = vst [vmem:[#allocation3] sm:$0x1] %v275_v18 }
  0x4e   : > { %v297_v19 = vstv %s296_s17  ;;  %v293_v28 = vld [vmem:[%s918_s2] sm:$0x1]  ;;  %v304_v31 = vstv %s282_s11 }
  0x4f   : > { %545 = vrcp.f32 %v297_v19  ;;  %v294_v30 = vld [vmem:[%s919_s3] sm:$0x1] }
  0x50   : > { %v305_v33 = vmul.f32 %v304_v31, %v294_v30 }
  0x52   : > { %v283_v21 = vld [vmem:[#allocation2] sm:$0x1] }
  0x53   : > { %v285_v22 = vmul.f32 0.033333335, %v283_v21 }
  0x54   : > { %v286_v25 = vld [vmem:[#allocation3] sm:$0x1] }
  0x55   : > { %v287_v23 = vmul.f32 30.0, %v285_v22  ;;  %v295_v32 = vsub.f32 %v285_v22, %v293_v28 }
  0x57   : > { %v288_v24 = vmul.f32 %v287_v23, %v285_v22  ;;  %v308_v35 = vmul.f32 %v295_v32, %v295_v32 }
  0x59   : > { %v289_v26 = vsub.f32 %v286_v25, %v288_v24 }
  0x5b   : > { %v291_v27 = vmul.f32 0.03448276, %v289_v26 }
  0x5c   : > { %v546_v20 = vpop.eup %545 }
  0x5d   : > { %475 = vpush %v546_v20  ;;  %v292_v29 = vmax.f32 %v291_v27, 0.0 }
  0x5f   : > { %v306_v34 = vmul.f32 30.0, %v292_v29 }
  0x61   : > { %v307_v37 = vadd.f32 %v306_v34, %v305_v33 }
  0x8e   : > { %s476_s25 = spop %475 }
  0x8f   : > { %s300_s26 = smul.f32 30.0, %s476_s25 }
  0x90   : > { %s313_s8 = smul.f32 %s476_s25, %s309_s24 }
  0x91   : > { %v301_v36 = vstv %s300_s26 }
  0x92   : > { %v302_v38 = vmul.f32 %v301_v36, %v295_v32  ;;  %v314_v39 = vstv %s313_s8 }
  0x93   : > { %v315_v40 = vmul.f32 %v314_v39, %v308_v35 }
  0x94   : > { %v303_v41 = vadd.f32 %v302_v38, %v293_v28 }
  0x95   : > { %v316_v42 = vadd.f32 %v315_v40, %v307_v37 }
  0x96   : > { %320 = vst [vmem:[#allocation9] sm:$0x1] %v303_v41  ;;  %332 = vst [vmem:[#allocation12] sm:$0x1] %v303_v41 }
  0x97   : > { %v319_v43 = vmul.f32 %v546_v20, %v316_v42 }
  0x99   : > { %321 = vst [vmem:[#allocation10] sm:$0x1] %v319_v43  ;;  %547 = vrsqrt.f32 %v319_v43  ;;  %vm324_vm0 = vcmp.eq.f32.partialorder %v319_v43, inf  ;;  %v327_v46 = vand.u32 2147483648, %v319_v43  ;;  %vm326_vm1 = vcmp.eq.f32.partialorder %v319_v43, 0.0 }
  0xa6   : > { %v548_v44 = vpop.eup %547 }
  0xa7   : > { %v323_v45 = vmul.f32 %v548_v44, %v319_v43 }
  0xa9   : > { %v325_v47 = vsel %vm324_vm0, %v319_v43, %v323_v45 }
  0xaa   : > { %v328_v48 = vsel %vm326_vm1, %v327_v46, %v325_v47 }
  0xab   : > { %v329_v49 = vadd.f32 1e-08, %v328_v48 }
  0xad   : > { %549 = vrcp.f32 %v329_v49 }
  0xba   : > { %v550_v50 = vpop.eup %549 }
  0xbb   : > { %333 = vst [vmem:[#allocation13] sm:$0x1] %v550_v50 }
  0xbc PF: > { %p500_p10 = scmp.eq.s32.totalorder %s791_s0, 3  ;;  %s725_s9 = smov [#allocation10]  }
  0xbd   : > { %s352_s12 = sshll.u32 %s725_s9, 4  ;;  %s726_s13 = smov [#allocation9]   ;;  %s353_s12 = int_to_ptr.vmem [resolvable:$true] %s352_s12 }
  0xbe   : > { %s341_s14 = sshll.u32 %s726_s13, 4  ;;  %s579_s15 = scalar_lea.vmem %s353_s12, 16  ;;  %s342_s14 = int_to_ptr.vmem [resolvable:$true] %s341_s14 }
  0xbf   : > { %p580_p2 = scmp.ne.s32.totalorder %s353_s12, %s579_s15  ;;  %s585_s16 = scalar_lea.vmem %s353_s12, 32 }
  0xc0   : > { %p586_p5 = scmp.lt.s32.totalorder %s353_s12, %s353_s12  ;;  %p587_p6 = scmp.lt.s32.totalorder %s585_s16, %s579_s15 }
  0xc1   : > { %p581_p3 = pnand %p580_p2, %p500_p10 }
  0xc2   : > { %p588_p11 = por %p587_p6, %p586_p5 }
  0xc3   : > { %p582_p4 = pneg %p581_p3 }
  0xc5   : > { %p589_p13 = pnand %p588_p11, %p582_p4 }
  0xc7   : > { %592 = shalt.err (!%p589_p13)
}
  0xc8   : > { %482 = dma.vmem_to_hbm [thread:$0]  (%p500_p10), %s353_s12, 16, %s921_s5, [#allocation11]  }
  0xc9   : > { %s603_s29 = scalar_lea.vmem %s342_s14, 16  ;;  %s609_s11 = scalar_lea.vmem %s342_s14, 32 }
  0xca   : > { %p604_p0 = scmp.ne.s32.totalorder %s342_s14, %s603_s29  ;;  %p610_p9 = scmp.lt.s32.totalorder %s342_s14, %s342_s14 }
  0xcb   : > { %p611_p7 = scmp.lt.s32.totalorder %s609_s11, %s603_s29 }
  0xcc   : > { %p605_p1 = pnand %p604_p0, %p500_p10 }
  0xcd   : > { %p612_p8 = por %p611_p7, %p610_p9 }
  0xce   : > { %p606_p12 = pneg %p605_p1 }
  0xd0   : > { %p613_p2 = pnand %p612_p8, %p606_p12 }
  0xd2   : > { %616 = shalt.err (!%p613_p2)
}
  0xd3   : > { %480 = dma.vmem_to_hbm [thread:$0]  (%p500_p10), %s342_s14, 16, %s920_s4, [#allocation8]  }
  0xd4   : > { %s727_s20 = smov [#allocation12]   ;;  %s728_s23 = smov [#allocation13]  }
  0xd5   : > { %s363_s21 = sshll.u32 %s727_s20, 4  ;;  %s374_s24 = sshll.u32 %s728_s23, 4  ;;  %s364_s21 = int_to_ptr.vmem [resolvable:$true] %s363_s21  ;;  %s375_s24 = int_to_ptr.vmem [resolvable:$true] %s374_s24 }
  0xd6   : > { %s627_s25 = scalar_lea.vmem %s364_s21, 16  ;;  %s633_s26 = scalar_lea.vmem %s364_s21, 32 }
  0xd7   : > { %p628_p3 = scmp.ne.s32.totalorder %s364_s21, %s627_s25  ;;  %p634_p6 = scmp.lt.s32.totalorder %s364_s21, %s364_s21 }
  0xd8   : > { %p635_p11 = scmp.lt.s32.totalorder %s633_s26, %s627_s25 }
  0xd9   : > { %p629_p4 = pnand %p628_p3, %p500_p10 }
  0xda   : > { %p636_p13 = por %p635_p11, %p634_p6 }
  0xdb   : > { %p630_p5 = pneg %p629_p4 }
  0xdd   : > { %p637_p0 = pnand %p636_p13, %p630_p5 }
  0xdf   : > { %640 = shalt.err (!%p637_p0)
}
  0xe0   : > { %484 = dma.vmem_to_hbm [thread:$0]  (%p500_p10), %s364_s21, 16, %s922_s6, [#allocation11]  }
  0xe1   : > { %s651_s12 = scalar_lea.vmem %s375_s24, 16  ;;  %s657_s13 = scalar_lea.vmem %s375_s24, 32 }
  0xe2   : > { %p652_p1 = scmp.ne.s32.totalorder %s375_s24, %s651_s12  ;;  %p658_p7 = scmp.lt.s32.totalorder %s375_s24, %s375_s24 }
  0xe3   : > { %p659_p8 = scmp.lt.s32.totalorder %s657_s13, %s651_s12 }
  0xe4   : > { %p653_p12 = pnand %p652_p1, %p500_p10 }
  0xe5   : > { %p660_p2 = por %p659_p8, %p658_p7 }
  0xe6   : > { %p654_p9 = pneg %p653_p12 }
  0xe8   : > { %p661_p3 = pnand %p660_p2, %p654_p9 }
  0xea   : > { %664 = shalt.err (!%p661_p3)
}
  0xeb   : > { %486 = dma.vmem_to_hbm [thread:$0]  (%p500_p10), %s375_s24, 16, %s923_s7, [#allocation14]  }
  0xec   : > { %696 = dma.done.wait (%p500_p10), [#allocation8], 16  }
  0xed   : > { %698 = vsyncadd (%p500_p10), [#allocation8], 4294967280 }
  0xee   : > { %700 = dma.done.wait (%p500_p10), [#allocation11], 32  }
  0xef   : > { %702 = vsyncadd (%p500_p10), [#allocation11], 4294967264 }
  0xf0   : > { %704 = dma.done.wait (%p500_p10), [#allocation14], 16  }
  0xf1   : > { %706 = vsyncadd (%p500_p10), [#allocation14], 4294967280 }
  0xf2 PF: > { %p22_p4 = scmp.ge.s32.totalorder %s794_s30, 6   ;;  %s930_s26 = smov %s713_s27 }
  0xf3   : > { %s931_s27 = smov %s717_s28  ;;  %s932_s28 = smov %s804_s10 }
  0xf4   : > { %s933_s29 = smov %s794_s30  ;;  %24 = sbr.rel (!%p22_p4) target bundleno = 8 (0x8), region = 101 }
  0xf9   :  { %399 = vsyncpa [#allocation7], 1 }
  0xfa   :  { %401 = vsyncpa [#allocation7 + $0x1], 1 }
  0xfb   :  { %402 = vsyncpa [#allocation8], 1 }
  0xfc   :  { %404 = vsyncpa [#allocation8 + $0x1], 1 }
  0xfd   :  { %405 = vsyncpa [#allocation11], 1 }
  0xfe   :  { %406 = vsyncpa [#allocation14], 1 }

</bundles_post_ra>
